<compile_context>
chip_gen: v5e
topology: v5e:2x2
jax: 0.10.0
libtpu: 0.0.40
codegen_flags: <defaults>
</compile_context>

<pallas_src>
import jax
import jax.numpy as jnp
from jax.experimental import pallas as pl
from jax.experimental.pallas import tpu as pltpu


def _gelu_exact(x):
    # PyTorch nn.GELU() default is the exact (erf) formulation.
    return 0.5 * x * (1.0 + jax.lax.erf(x * jnp.float32(0.7071067811865476)))


def _round_up(n, m):
    return ((n + m - 1) // m) * m


def _sublane(dtype):
    # Rows per packed vreg: 8 for 4-byte, 16 for 2-byte, 32 for 1-byte dtypes.
    return max(8, 32 // jnp.dtype(dtype).itemsize)


def _vmem_budget_bytes():
    """Usable VMEM budget: device capacity minus compiler/internal headroom."""
    cap = 64 << 20  # conservative fallback (v7x per-TC capacity)
    try:
        info = pltpu.get_tpu_info()
        cap = int(getattr(info, "vmem_capacity_bytes", cap)) or cap
    except Exception:
        pass
    # ~52 MiB on 64 MiB parts, ~105 MiB on 128 MiB parts.
    return min(cap - (12 << 20), int(cap * 0.82))


def _choose_config(N, IN_p, HID_p, OUT_p, dtype, budget, tm_pref=512):
    """Pick (tm, tk, weight_resident) from an exact per-buffer VMEM sum."""
    it = jnp.dtype(dtype).itemsize
    row_cap = _round_up(N, _sublane(dtype))

    def resident_bytes(tm):
        return (2 * tm * IN_p * it            # x tile (double-buffered)
                + 2 * IN_p * HID_p * it       # W1 (full)
                + 2 * 8 * HID_p * it          # b1 (sublane-padded)
                + 2 * HID_p * OUT_p * it      # W2 (full)
                + 2 * 8 * OUT_p * it          # b2
                + 2 * tm * OUT_p * it         # out tile
                + 2 * tm * HID_p * 4          # f32 hidden intermediate headroom
                + (1 << 20))                  # internal scratch headroom

    def streamed_bytes(tm, tk):
        return (2 * tm * IN_p * it
                + 2 * IN_p * tk * it
                + 2 * 8 * tk * it
                + 2 * tk * OUT_p * it
                + 2 * 8 * OUT_p * it
                + 2 * tm * OUT_p * it
                + tm * OUT_p * 4              # f32 accumulator scratch
                + 2 * tm * tk * 4             # f32 hidden slice headroom
                + (1 << 20))

    # Prefer full-weight residency: k-grid collapses to 1, weights DMA'd once.
    for tm in (tm_pref, 512, 256, 128):
        tm = min(tm, row_cap)
        if resident_bytes(tm) <= budget:
            return tm, HID_p, True
    # Streamed-HID fallback: largest tk first to cut accumulator RMW traffic
    # and per-step grid overhead.
    for tm, tk in ((tm_pref, 512), (512, 512), (256, 512), (256, 256),
                   (128, 256), (128, 128)):
        tm = min(tm, row_cap)
        tk = min(tk, HID_p)
        if streamed_bytes(tm, tk) <= budget:
            return tm, tk, False
    return min(128, row_cap), min(128, HID_p), False


def mlp_kernel_resident(x_ref, w1_ref, b1_ref, w2_ref, b2_ref, o_ref):
    # Whole hidden dim resident: no accumulator scratch, direct write.
    h = jnp.dot(x_ref[...], w1_ref[...], preferred_element_type=jnp.float32)
    h = _gelu_exact(h + b1_ref[...])
    # Dropout p=0.0 -> identity.
    y = jnp.dot(h.astype(w2_ref.dtype), w2_ref[...],
                preferred_element_type=jnp.float32)
    o_ref[...] = (y + b2_ref[...]).astype(o_ref.dtype)


def mlp_kernel_streamed(x_ref, w1_ref, b1_ref, w2_ref, b2_ref, o_ref, acc_ref):
    # Hidden dim streamed along grid axis 1; fc2 partials accumulated in f32.
    k = pl.program_id(1)

    @pl.when(k == 0)
    def _init():
        acc_ref[...] = jnp.zeros_like(acc_ref)

    h = jnp.dot(x_ref[...], w1_ref[...], preferred_element_type=jnp.float32)
    h = _gelu_exact(h + b1_ref[...])
    # Dropout p=0.0 -> identity.
    acc_ref[...] += jnp.dot(h.astype(w2_ref.dtype), w2_ref[...],
                            preferred_element_type=jnp.float32)

    @pl.when(k == pl.num_programs(1) - 1)
    def _finish():
        o_ref[...] = (acc_ref[...] + b2_ref[...]).astype(o_ref.dtype)


def mlp_pallas(x, w1, b1, w2, b2, *, tm=None, tk=None, force_streamed=False):
    """x: [B, S, in]; w1: [in, hid]; b1: [hid]; w2: [hid, out]; b2: [out].

    Weights are stored pre-transposed ([in, hid] / [hid, out]) so the hot path
    is plain x @ W + b on the MXU.
    """
    B, S, IN = x.shape
    HID = w1.shape[1]
    OUT = w2.shape[1]
    N = B * S
    dtype = x.dtype
    itemsize = jnp.dtype(dtype).itemsize
    sub = _sublane(dtype)

    # Lane-dense feature padding (multiples of 128) -> unmasked full-lane
    # loads/stores, full MXU passes.
    IN_p = _round_up(IN, 128)
    HID_p = _round_up(HID, 128)
    OUT_p = _round_up(OUT, 128)

    budget = _vmem_budget_bytes()
    tm_auto, tk_auto, resident = _choose_config(N, IN_p, HID_p, OUT_p, dtype,
                                                budget)
    if force_streamed:
        resident = False
    if tm is None:
        tm = tm_auto
    if tk is None:
        tk = HID_p if resident else tk_auto

    tm_eff = min(_round_up(tm, sub), _round_up(N, sub))
    N_p = _round_up(N, tm_eff)

    tk_eff = min(_round_up(tk, 128), HID_p)
    resident = resident and tk_eff >= HID_p
    HID_pp = HID_p if resident else _round_up(HID_p, tk_eff)

    # Zero-pad (skipped when already aligned).  In a real model the weight/bias
    # pads belong in one-time parameter prep, not the per-call path.
    x2d = x.reshape(N, IN)
    if N_p != N or IN_p != IN:
        x2d = jnp.pad(x2d, ((0, N_p - N), (0, IN_p - IN)))
    w1_p = w1 if (IN_p == IN and HID_pp == HID) else jnp.pad(
        w1, ((0, IN_p - IN), (0, HID_pp - HID)))
    b1_p = (b1 if HID_pp == HID else jnp.pad(b1, (0, HID_pp - HID))
            ).reshape(1, HID_pp)
    w2_p = w2 if (HID_pp == HID and OUT_p == OUT) else jnp.pad(
        w2, ((0, HID_pp - HID), (0, OUT_p - OUT)))
    b2_p = (b2 if OUT_p == OUT else jnp.pad(b2, (0, OUT_p - OUT))
            ).reshape(1, OUT_p)

    num_row_tiles = N_p // tm_eff

    if resident:
        grid = (num_row_tiles,)
        in_specs = [
            pl.BlockSpec((tm_eff, IN_p), lambda i: (i, 0)),    # x rows
            pl.BlockSpec((IN_p, HID_pp), lambda i: (0, 0)),    # W1 (resident)
            pl.BlockSpec((1, HID_pp), lambda i: (0, 0)),       # b1
            pl.BlockSpec((HID_pp, OUT_p), lambda i: (0, 0)),   # W2 (resident)
            pl.BlockSpec((1, OUT_p), lambda i: (0, 0)),        # b2
        ]
        out_specs = pl.BlockSpec((tm_eff, OUT_p), lambda i: (i, 0))
        scratch_shapes = []
        kernel = mlp_kernel_resident
        dims = ("parallel",)
        weight_fetches = 1                       # constant index maps: once
    else:
        grid = (num_row_tiles, HID_pp // tk_eff)
        in_specs = [
            pl.BlockSpec((tm_eff, IN_p), lambda i, k: (i, 0)),   # x rows
            pl.BlockSpec((IN_p, tk_eff), lambda i, k: (0, k)),   # W1 slice
            pl.BlockSpec((1, tk_eff), lambda i, k: (0, k)),      # b1 slice
            pl.BlockSpec((tk_eff, OUT_p), lambda i, k: (k, 0)),  # W2 slice
            pl.BlockSpec((1, OUT_p), lambda i, k: (0, 0)),       # b2
        ]
        out_specs = pl.BlockSpec((tm_eff, OUT_p), lambda i, k: (i, 0))
        scratch_shapes = [pltpu.VMEM((tm_eff, OUT_p), jnp.float32)]
        kernel = mlp_kernel_streamed
        dims = ("parallel", "arbitrary")
        weight_fetches = num_row_tiles           # slices re-streamed per row tile

    weight_bytes = (w1_p.size + w2_p.size + b1_p.size) * itemsize
    cost = pl.CostEstimate(
        flops=2 * N_p * (IN_p * HID_pp + HID_pp * OUT_p),
        transcendentals=N_p * HID_pp,
        bytes_accessed=(x2d.size + N_p * OUT_p + b2_p.size) * itemsize
                       + weight_fetches * weight_bytes,
    )

    out2d = pl.pallas_call(
        kernel,
        out_shape=jax.ShapeDtypeStruct((N_p, OUT_p), dtype),
        grid_spec=pltpu.PrefetchScalarGridSpec(
            num_scalar_prefetch=0,
            grid=grid,
            in_specs=in_specs,
            out_specs=out_specs,
            scratch_shapes=scratch_shapes,
        ),
        compiler_params=pltpu.CompilerParams(
            dimension_semantics=dims,
            vmem_limit_bytes=int(budget),
        ),
        cost_estimate=cost,
    )(x2d, w1_p, b1_p, w2_p, b2_p)

    if N_p != N or OUT_p != OUT:
        out2d = out2d[:N, :OUT]
    return out2d.reshape(B, S, OUT)


def mlp_reference(x, w1, b1, w2, b2):
    h = jnp.dot(x, w1) + b1
    h = 0.5 * h * (1.0 + jax.lax.erf(h * jnp.float32(0.7071067811865476)))
    return jnp.dot(h, w2) + b2


if __name__ == "__main__":
    # Small shapes consistent with the module: tokens [B, S, in_features].
    B, S = 2, 8
    IN_FEATURES = 32
    HIDDEN_FEATURES = 64
    OUT_FEATURES = 32  # out_features defaults to in_features

    key = jax.random.PRNGKey(0)
    kx, k1, kb1, k2, kb2, k3, kb3 = jax.random.split(key, 7)

    x = jax.random.normal(kx, (B, S, IN_FEATURES), dtype=jnp.float32)
    # nn.Linear weights stored pre-transposed as [in, out] for the kernel.
    w1 = jax.random.normal(k1, (IN_FEATURES, HIDDEN_FEATURES), jnp.float32) * 0.05
    b1 = jax.random.normal(kb1, (HIDDEN_FEATURES,), jnp.float32) * 0.05
    w2 = jax.random.normal(k2, (HIDDEN_FEATURES, OUT_FEATURES), jnp.float32) * 0.05
    b2 = jax.random.normal(kb2, (OUT_FEATURES,), jnp.float32) * 0.05

    # Path 1: full-weight-residency fast path (no accumulator scratch).
    out = jax.block_until_ready(mlp_pallas(x, w1, b1, w2, b2))
    ref = mlp_reference(x, w1, b1, w2, b2)
    assert out.shape == (B, S, OUT_FEATURES)
    assert jnp.allclose(out, ref, atol=1e-5, rtol=1e-5), "resident path mismatch"

    # Path 2: streamed-hidden accumulator path (HID=192 -> padded 256, tk=128
    # gives two k-steps, exercising the pl.when init/finalize logic).
    HID2 = 192
    w1b = jax.random.normal(k3, (IN_FEATURES, HID2), jnp.float32) * 0.05
    b1b = jax.random.normal(kb3, (HID2,), jnp.float32) * 0.05
    w2b = jax.random.normal(k2, (HID2, OUT_FEATURES), jnp.float32) * 0.05
    out2 = jax.block_until_ready(
        mlp_pallas(x, w1b, b1b, w2b, b2, tk=128, force_streamed=True))
    ref2 = mlp_reference(x, w1b, b1b, w2b, b2)
    assert jnp.allclose(out2, ref2, atol=1e-5, rtol=1e-5), "streamed path mismatch"

    print("KERNEL_OK")
</pallas_src>

<mosaic_0001>
module attributes {stable_mosaic.version = 11 : i64} {
  func.func @mlp_kernel_resident(%arg0: i32, %arg1: memref<16x128xf32, #tpu.memory_space<vmem>>, %arg2: memref<128x128xf32, #tpu.memory_space<vmem>>, %arg3: memref<1x128xf32, #tpu.memory_space<vmem>>, %arg4: memref<128x128xf32, #tpu.memory_space<vmem>>, %arg5: memref<1x128xf32, #tpu.memory_space<vmem>>, %arg6: memref<16x128xf32, #tpu.memory_space<vmem>>) attributes {dimension_semantics = [#tpu.dimension_semantics<parallel>], iteration_bounds = array<i64: 1>, scalar_prefetch = 0 : i64, scratch_operands = 0 : i64, tpu.core_type = #tpu.core_type<tc>, window_params = [{transform_indices = @transform_0, window_bounds = array<i64: 16, 128>}, {pipeline_mode = #tpu.pipeline_mode<synchronous>, transform_indices = @transform_1, window_bounds = array<i64: 128, 128>}, {pipeline_mode = #tpu.pipeline_mode<synchronous>, transform_indices = @transform_2, window_bounds = array<i64: 1, 128>}, {pipeline_mode = #tpu.pipeline_mode<synchronous>, transform_indices = @transform_3, window_bounds = array<i64: 128, 128>}, {pipeline_mode = #tpu.pipeline_mode<synchronous>, transform_indices = @transform_4, window_bounds = array<i64: 1, 128>}, {transform_indices = @transform_5, window_bounds = array<i64: 16, 128>}]} {
    %c0 = arith.constant 0 : index
    %c0_0 = arith.constant 0 : index
    %0 = vector.load %arg1[%c0, %c0_0] : memref<16x128xf32, #tpu.memory_space<vmem>>, vector<16x128xf32>
    %c0_1 = arith.constant 0 : index
    %c0_2 = arith.constant 0 : index
    %1 = vector.load %arg2[%c0_1, %c0_2] : memref<128x128xf32, #tpu.memory_space<vmem>>, vector<128x128xf32>
    %cst = arith.constant dense<0.000000e+00> : vector<16x128xf32>
    %2 = tpu.matmul %0, %1, %cst {dimension_numbers = #tpu.dot_dimension_numbers<[1], [0], [0], [1], [0, 0, 1, 1], [], []>} : vector<16x128xf32>, vector<128x128xf32>, vector<16x128xf32> -> vector<16x128xf32>
    %c0_3 = arith.constant 0 : index
    %c0_4 = arith.constant 0 : index
    %3 = vector.load %arg3[%c0_3, %c0_4] : memref<1x128xf32, #tpu.memory_space<vmem>>, vector<1x128xf32>
    %4 = vector.broadcast %3 : vector<1x128xf32> to vector<16x128xf32>
    %5 = arith.addf %2, %4 : vector<16x128xf32>
    %cst_5 = arith.constant 5.000000e-01 : f32
    %6 = vector.broadcast %cst_5 : f32 to vector<16x128xf32>
    %7 = arith.mulf %6, %5 : vector<16x128xf32>
    %cst_6 = arith.constant 0.707106769 : f32
    %8 = vector.broadcast %cst_6 : f32 to vector<16x128xf32>
    %9 = arith.mulf %5, %8 : vector<16x128xf32>
    %10 = math.erf %9 : vector<16x128xf32>
    %cst_7 = arith.constant 1.000000e+00 : f32
    %11 = vector.broadcast %cst_7 : f32 to vector<16x128xf32>
    %12 = arith.addf %11, %10 : vector<16x128xf32>
    %13 = arith.mulf %7, %12 : vector<16x128xf32>
    %c0_8 = arith.constant 0 : index
    %c0_9 = arith.constant 0 : index
    %14 = vector.load %arg4[%c0_8, %c0_9] : memref<128x128xf32, #tpu.memory_space<vmem>>, vector<128x128xf32>
    %cst_10 = arith.constant dense<0.000000e+00> : vector<16x128xf32>
    %15 = tpu.matmul %13, %14, %cst_10 {dimension_numbers = #tpu.dot_dimension_numbers<[1], [0], [0], [1], [0, 0, 1, 1], [], []>} : vector<16x128xf32>, vector<128x128xf32>, vector<16x128xf32> -> vector<16x128xf32>
    %c0_11 = arith.constant 0 : index
    %c0_12 = arith.constant 0 : index
    %16 = vector.load %arg5[%c0_11, %c0_12] : memref<1x128xf32, #tpu.memory_space<vmem>>, vector<1x128xf32>
    %17 = vector.broadcast %16 : vector<1x128xf32> to vector<16x128xf32>
    %18 = arith.addf %15, %17 : vector<16x128xf32>
    %c0_13 = arith.constant 0 : index
    %c0_14 = arith.constant 0 : index
    %19 = vector.load %arg6[%c0_13, %c0_14] : memref<16x128xf32, #tpu.memory_space<vmem>>, vector<16x128xf32>
    tpu.vector_store %arg6[%c0_13, %c0_14], %18 {strides = array<i32>} : memref<16x128xf32, #tpu.memory_space<vmem>>, vector<16x128xf32>,
    return
  }
  func.func @transform_0(%arg0: i32) -> (i32, i32) {
    %c0_i32 = arith.constant 0 : i32
    %c0_i32_0 = arith.constant 0 : i32
    return %arg0, %c0_i32 : i32, i32
  }
  func.func @transform_1(%arg0: i32) -> (i32, i32) {
    %c0_i32 = arith.constant 0 : i32
    %c0_i32_0 = arith.constant 0 : i32
    %c0_i32_1 = arith.constant 0 : i32
    return %c0_i32, %c0_i32_0 : i32, i32
  }
  func.func @transform_2(%arg0: i32) -> (i32, i32) {
    %c0_i32 = arith.constant 0 : i32
    %c0_i32_0 = arith.constant 0 : i32
    %c0_i32_1 = arith.constant 0 : i32
    return %c0_i32, %c0_i32_0 : i32, i32
  }
  func.func @transform_3(%arg0: i32) -> (i32, i32) {
    %c0_i32 = arith.constant 0 : i32
    %c0_i32_0 = arith.constant 0 : i32
    %c0_i32_1 = arith.constant 0 : i32
    return %c0_i32, %c0_i32_0 : i32, i32
  }
  func.func @transform_4(%arg0: i32) -> (i32, i32) {
    %c0_i32 = arith.constant 0 : i32
    %c0_i32_0 = arith.constant 0 : i32
    %c0_i32_1 = arith.constant 0 : i32
    return %c0_i32, %c0_i32_0 : i32, i32
  }
  func.func @transform_5(%arg0: i32) -> (i32, i32) {
    %c0_i32 = arith.constant 0 : i32
    %c0_i32_0 = arith.constant 0 : i32
    return %arg0, %c0_i32 : i32, i32
  }
}

</mosaic_0001>

<bundles_post_ra>
// kernel: tpu_custom_call.1
= control target key start
LH: loop header
LB: loop body
LE: loop exit
PB: predicated region body
PF: predicated region fallthrough
CT: control target
= control target key end

     0   :  { %10 = vsyncpa [#allocation3], 0  ;;  %s510_s0 = inlined_call_operand.hbm [shape: f32[16,128], index: 0, kind: input, shape index: {}]   ;;  %s511_s1 = inlined_call_operand.hbm [shape: f32[128,128], index: 1, kind: input, shape index: {}]   ;;  %s512_s2 = inlined_call_operand.vmem [shape: f32[1,128], index: 2, kind: input, shape index: {}]   ;;  %s513_s3 = inlined_call_operand.hbm [shape: f32[128,128], index: 3, kind: input, shape index: {}]   ;;  %s514_s4 = inlined_call_operand.vmem [shape: f32[1,128], index: 4, kind: input, shape index: {}]   ;;  %s515_s5 = inlined_call_operand.hbm [shape: f32[16,128], index: 5, kind: output, shape index: {}]  }
   0x1   :  { %11 = vsyncpa [#allocation6], 0 }
   0x2   :  { %12 = vsyncpa [#allocation4], 0  ;;  %s30_s20 = sshll.u32 %s511_s1, 4  ;;  %s414_s21 = smov [#allocation5]   ;;  %s31_s20 = int_to_ptr.hbm [resolvable:$true] %s30_s20 }
   0x3   :  { %s32_s22 = sshll.u32 %s414_s21, 4  ;;  %s17_s25 = sshll.u32 %s510_s0, 4  ;;  %s33_s22 = int_to_ptr.vmem [resolvable:$true] %s32_s22  ;;  %s18_s25 = int_to_ptr.hbm [resolvable:$true] %s17_s25 }
   0x4   :  { %s415_s26 = smov 128   ;;  %s416_s27 = smov 8  }
   0x5   :  { %38 = dma.hbm_to_vmem [thread:$0]  %s31_s20, 2048, %s33_s22, [#allocation6], %s415_s26, %s415_s26, %s416_s27  }
   0x6   :  { %s417_s28 = smov [#allocation2]   ;;  %s45_s1 = sshll.u32 %s513_s3, 4  ;;  %s46_s1 = int_to_ptr.hbm [resolvable:$true] %s45_s1 }
   0x7   :  { %s19_s29 = sshll.u32 %s417_s28, 4  ;;  %s418_s0 = smov [#allocation7]   ;;  %s20_s29 = int_to_ptr.vmem [resolvable:$true] %s19_s29 }
   0x8   :  { %25 = dma.hbm_to_vmem [thread:$0]  %s18_s25, 256, %s20_s29, [#allocation3], %s415_s26, %s415_s26, %s416_s27  }
   0x9   :  { %s47_s7 = sshll.u32 %s418_s0, 4  ;;  %s48_s7 = int_to_ptr.vmem [resolvable:$true] %s47_s7 }
   0xa   :  { %53 = dma.hbm_to_vmem [thread:$0]  %s46_s1, 2048, %s48_s7, [#allocation6], %s415_s26, %s415_s26, %s416_s27  }
   0xb   :  { %408 = dma.done.wait [#allocation3], 256  }
   0xc   :  { %409 = vsyncadd [#allocation3], 4294967040 }
   0xd   :  { %410 = dma.done.wait [#allocation6], 4096  }
   0xe   :  { %411 = vsyncadd [#allocation6], 4294963200  ;;  %v85_v0 = vld [vmem:[#allocation5 + $0x78] sm:$0xff]  ;;  %v84_v1 = vld [vmem:[#allocation5 + $0x70] sm:$0xff]  ;;  %s419_s10 = smov [#allocation8]   ;;  %s252_s14 = sshll.u32 %s515_s5, 4  ;;  %s253_s14 = int_to_ptr.hbm [resolvable:$true] %s252_s14 }
   0xf   :  { %90 = vmatpush.msra.mxu0 %v85_v0  ;;  %268 = vmatpush.msra.mxu2 %v85_v0  ;;  %v83_v2 = vld [vmem:[#allocation5 + $0x68] sm:$0xff]  ;;  %v82_v3 = vld [vmem:[#allocation5 + $0x60] sm:$0xff]  ;;  %v81_v4 = vld [vmem:[#allocation5 + $0x58] sm:$0xff]  ;;  %s250_s11 = sshll.u32 %s419_s10, 4  ;;  %s251_s11 = int_to_ptr.vmem [resolvable:$true] %s250_s11 }
  0x10   :  { %v80_v5 = vld [vmem:[#allocation5 + $0x50] sm:$0xff]  ;;  %v79_v6 = vld [vmem:[#allocation5 + $0x48] sm:$0xff]  ;;  %v78_v7 = vld [vmem:[#allocation5 + $0x40] sm:$0xff] }
  0x11   :  { %91 = vmatpush.msra.mxu0 %v84_v1  ;;  %269 = vmatpush.msra.mxu2 %v84_v1  ;;  %v77_v8 = vld [vmem:[#allocation5 + $0x38] sm:$0xff]  ;;  %v76_v9 = vld [vmem:[#allocation5 + $0x30] sm:$0xff]  ;;  %v75_v10 = vld [vmem:[#allocation5 + $0x28] sm:$0xff] }
  0x12   :  { %v74_v11 = vld [vmem:[#allocation5 + $0x20] sm:$0xff]  ;;  %v73_v12 = vld [vmem:[#allocation5 + $0x18] sm:$0xff]  ;;  %v72_v13 = vld [vmem:[#allocation5 + $0x10] sm:$0xff] }
  0x13   :  { %92 = vmatpush.msra.mxu0 %v83_v2  ;;  %270 = vmatpush.msra.mxu2 %v83_v2  ;;  %v71_v14 = vld [vmem:[#allocation5 + $0x8] sm:$0xff]  ;;  %v70_v15 = vld [vmem:[#allocation5] sm:$0xff]  ;;  %v68_v16 = vld [vmem:[#allocation2] sm:$0xff] }
  0x14   :  { %v69_v17 = vld [vmem:[#allocation2 + $0x8] sm:$0xff]  ;;  %v215_v19 = vld [vmem:[#allocation7 + $0x70] sm:$0xff]  ;;  %v214_v20 = vld [vmem:[#allocation7 + $0x68] sm:$0xff] }
  0x15   :  { %93 = vmatpush.msra.mxu0 %v82_v3  ;;  %271 = vmatpush.msra.mxu2 %v82_v3  ;;  %v216_v18 = vld [vmem:[#allocation7 + $0x78] sm:$0xff]  ;;  %v213_v21 = vld [vmem:[#allocation7 + $0x60] sm:$0xff]  ;;  %v306_v22 = vld [vmem:[%s512_s2] ss:$0 sm:$0xff] }
  0x16   :  { %221 = vmatpush.msra.mxu1 %v216_v18  ;;  %284 = vmatpush.msra.mxu3 %v216_v18  ;;  %v212_v23 = vld [vmem:[#allocation7 + $0x58] sm:$0xff]  ;;  %v211_v25 = vld [vmem:[#allocation7 + $0x50] sm:$0xff]  ;;  %v210_v27 = vld [vmem:[#allocation7 + $0x48] sm:$0xff] }
  0x17   :  { %94 = vmatpush.msra.mxu0 %v81_v4  ;;  %272 = vmatpush.msra.mxu2 %v81_v4  ;;  %v209_v29 = vld [vmem:[#allocation7 + $0x40] sm:$0xff]  ;;  %v208_v30 = vld [vmem:[#allocation7 + $0x38] sm:$0xff]  ;;  %v207_v33 = vld [vmem:[#allocation7 + $0x30] sm:$0xff] }
  0x18   :  { %222 = vmatpush.msra.mxu1 %v215_v19  ;;  %285 = vmatpush.msra.mxu3 %v215_v19  ;;  %v206_v36 = vld [vmem:[#allocation7 + $0x28] sm:$0xff]  ;;  %v205_v39 = vld [vmem:[#allocation7 + $0x20] sm:$0xff]  ;;  %v204_v43 = vld [vmem:[#allocation7 + $0x18] sm:$0xff] }
  0x19   :  { %95 = vmatpush.msra.mxu0 %v80_v5  ;;  %273 = vmatpush.msra.mxu2 %v80_v5  ;;  %v203_v47 = vld [vmem:[#allocation7 + $0x10] sm:$0xff]  ;;  %v202_v52 = vld [vmem:[#allocation7 + $0x8] sm:$0xff]  ;;  %v201_v56 = vld [vmem:[#allocation7] sm:$0xff] }
  0x1a   :  { %223 = vmatpush.msra.mxu1 %v214_v20  ;;  %286 = vmatpush.msra.mxu3 %v214_v20 }
  0x1b   :  { %96 = vmatpush.msra.mxu0 %v79_v6  ;;  %274 = vmatpush.msra.mxu2 %v79_v6 }
  0x1c   :  { %224 = vmatpush.msra.mxu1 %v213_v21  ;;  %287 = vmatpush.msra.mxu3 %v213_v21 }
  0x1d   :  { %97 = vmatpush.msra.mxu0 %v78_v7  ;;  %275 = vmatpush.msra.mxu2 %v78_v7 }
  0x1e   :  { %225 = vmatpush.msra.mxu1 %v212_v23  ;;  %288 = vmatpush.msra.mxu3 %v212_v23 }
  0x1f   :  { %98 = vmatpush.msra.mxu0 %v77_v8  ;;  %276 = vmatpush.msra.mxu2 %v77_v8 }
  0x20   :  { %226 = vmatpush.msra.mxu1 %v211_v25  ;;  %289 = vmatpush.msra.mxu3 %v211_v25 }
  0x21   :  { %99 = vmatpush.msra.mxu0 %v76_v9  ;;  %277 = vmatpush.msra.mxu2 %v76_v9 }
  0x22   :  { %227 = vmatpush.msra.mxu1 %v210_v27  ;;  %290 = vmatpush.msra.mxu3 %v210_v27 }
  0x23   :  { %100 = vmatpush.msra.mxu0 %v75_v10  ;;  %278 = vmatpush.msra.mxu2 %v75_v10 }
  0x24   :  { %228 = vmatpush.msra.mxu1 %v209_v29  ;;  %291 = vmatpush.msra.mxu3 %v209_v29 }
  0x25   :  { %101 = vmatpush.msra.mxu0 %v74_v11  ;;  %279 = vmatpush.msra.mxu2 %v74_v11 }
  0x26   :  { %229 = vmatpush.msra.mxu1 %v208_v30  ;;  %292 = vmatpush.msra.mxu3 %v208_v30 }
  0x27   :  { %102 = vmatpush.msra.mxu0 %v73_v12  ;;  %280 = vmatpush.msra.mxu2 %v73_v12 }
  0x28   :  { %230 = vmatpush.msra.mxu1 %v207_v33  ;;  %293 = vmatpush.msra.mxu3 %v207_v33 }
  0x29   :  { %103 = vmatpush.msra.mxu0 %v72_v13  ;;  %281 = vmatpush.msra.mxu2 %v72_v13 }
  0x2a   :  { %231 = vmatpush.msra.mxu1 %v206_v36  ;;  %294 = vmatpush.msra.mxu3 %v206_v36 }
  0x2b   :  { %104 = vmatpush.msra.mxu0 %v71_v14  ;;  %282 = vmatpush.msra.mxu2 %v71_v14 }
  0x2c   :  { %232 = vmatpush.msra.mxu1 %v205_v39  ;;  %295 = vmatpush.msra.mxu3 %v205_v39 }
  0x2d   :  { %105 = vmatpush.msra.mxu0 %v70_v15  ;;  %283 = vmatpush.msra.mxu2 %v70_v15 }
  0x2e   :  { %106 = vmatmul.f32.vlgmr.msra.gmra.mxu0 %v68_v16  ;;  %109 = vmatmul.f32.vlgmr.msra.gmra.mxu2 %v69_v17 }
  0x2f   :  { %233 = vmatpush.msra.mxu1 %v204_v43  ;;  %296 = vmatpush.msra.mxu3 %v204_v43 }
  0x31   :  { %234 = vmatpush.msra.mxu1 %v203_v47  ;;  %297 = vmatpush.msra.mxu3 %v203_v47 }
  0x33   :  { %235 = vmatpush.msra.mxu1 %v202_v52  ;;  %298 = vmatpush.msra.mxu3 %v202_v52 }
  0x35   :  { %236 = vmatpush.msra.mxu1 %v201_v56  ;;  %299 = vmatpush.msra.mxu3 %v201_v56  ;;  %v307_v56 = vld [vmem:[%s514_s4] ss:$0 sm:$0xff] }
  0xab   :  { %v107_v24 = vpop.f32.mrf.mxu0 }
  0xac   :  { %v471_v26 = vadd.f32 %v306_v22, %v107_v24 }
  0xae   :  { %v474_v28 = vmul.f32 0.70710677, %v471_v26  ;;  %v113_v47 = vmul.f32 0.5, %v471_v26 }
  0xb0   :  { %v117_v31 = vmul.f32 %v474_v28, %v474_v28 }
  0xb1   :  { %v110_v32 = vpop.f32.mrf.mxu2 }
  0xb2   :  { %v478_v34 = vmin.f32 %v117_v31, 16.0  ;;  %v480_v35 = vadd.f32 %v306_v22, %v110_v32 }
  0xb4   :  { %v119_v37 = vmul.f32 2.1237322e-06, %v478_v34  ;;  %v484_v38 = vmul.f32 0.70710677, %v480_v35  ;;  %v130_v40 = vmul.f32 3.8918573e-05, %v478_v34 }
  0xb6   :  { %v120_v41 = vadd.f32 0.00028619796, %v119_v37  ;;  %v157_v42 = vmul.f32 %v484_v38, %v484_v38  ;;  %v131_v44 = vadd.f32 0.001143296, %v130_v40 }
  0xb8   :  { %v121_v45 = vmul.f32 %v120_v41, %v478_v34  ;;  %v158_v46 = vmin.f32 %v157_v42, 16.0  ;;  %v132_v48 = vmul.f32 %v131_v44, %v478_v34 }
  0xba   :  { %v159_v49 = vmul.f32 2.1237322e-06, %v158_v46  ;;  %v170_v50 = vmul.f32 3.8918573e-05, %v158_v46  ;;  %v122_v51 = vadd.f32 0.0036580483, %v121_v45 }
  0xbb   :  { %v133_v53 = vadd.f32 0.014752088, %v132_v48 }
  0xbc   :  { %v160_v54 = vadd.f32 0.00028619796, %v159_v49  ;;  %v171_v55 = vadd.f32 0.001143296, %v170_v50  ;;  %v123_v60 = vmul.f32 %v122_v51, %v478_v34 }
  0xbd   :  { %v134_v57 = vmul.f32 %v133_v53, %v478_v34  ;;  %v114_v53 = vmul.f32 0.5, %v480_v35 }
  0xbe   :  { %v161_v58 = vmul.f32 %v160_v54, %v158_v46  ;;  %v172_v59 = vmul.f32 %v171_v55, %v158_v46  ;;  %v124_v2 = vadd.f32 0.05243302, %v123_v60 }
  0xbf   :  { %v135_v61 = vadd.f32 0.112945676, %v134_v57 }
  0xc0   :  { %v162_v62 = vadd.f32 0.0036580483, %v161_v58  ;;  %v173_v63 = vadd.f32 0.014752088, %v172_v59  ;;  %v125_v8 = vmul.f32 %v124_v2, %v478_v34 }
  0xc1   :  { %v136_v0 = vmul.f32 %v135_v61, %v478_v34 }
  0xc2   :  { %v174_v1 = vmul.f32 %v173_v63, %v158_v46  ;;  %v163_v4 = vmul.f32 %v162_v62, %v158_v46  ;;  %v126_v13 = vadd.f32 0.18741608, %v125_v8 }
  0xc3   :  { %v137_v3 = vadd.f32 0.4994258, %v136_v0 }
  0xc4   :  { %v175_v5 = vadd.f32 0.112945676, %v174_v1  ;;  %v164_v10 = vadd.f32 0.05243302, %v163_v4  ;;  %v127_v17 = vmul.f32 %v126_v13, %v478_v34 }
  0xc5   :  { %v138_v6 = vmul.f32 %v137_v3, %v478_v34 }
  0xc6   :  { %v176_v7 = vmul.f32 %v175_v5, %v158_v46  ;;  %v165_v14 = vmul.f32 %v164_v10, %v158_v46  ;;  %v128_v21 = vadd.f32 1.1283791, %v127_v17 }
  0xc7   :  { %v139_v9 = vadd.f32 1.0, %v138_v6 }
  0xc8   :  { %v177_v11 = vadd.f32 0.4994258, %v176_v7  ;;  %v166_v18 = vadd.f32 0.18741608, %v165_v14  ;;  %v129_v31 = vmul.f32 %v128_v21, %v474_v28 }
  0xc9   :  { %308 = vrcp.f32 %v139_v9  ;;  %v151_v22 = vand.u32 2147483648, %v139_v9  ;;  %v149_v27 = vand.u32 2147483647, %v139_v9  ;;  %vm145_vm1 = vweird.f32 %v139_v9 }
  0xca   :  { %v178_v12 = vmul.f32 %v177_v11, %v158_v46  ;;  %v167_v24 = vmul.f32 %v166_v18, %v158_v46 }
  0xcb   :  { %v152_v32 = vor.u32 1.1754944e-38, %v151_v22  ;;  %vm150_vm3 = vcmp.eq.f32.partialorder %v149_v27, 8.507059e+37 }
  0xcc   :  { %v179_v15 = vadd.f32 1.0, %v178_v12  ;;  %v168_v36 = vadd.f32 1.1283791, %v167_v24 }
  0xce   :  { %310 = vrcp.f32 %v179_v15  ;;  %v191_v37 = vand.u32 2147483648, %v179_v15  ;;  %v189_v41 = vand.u32 2147483647, %v179_v15  ;;  %vm185_vm5 = vweird.f32 %v179_v15 }
  0xcf   :  { %v309_v16 = vpop.eup %308  ;;  %v169_v46 = vmul.f32 %v168_v36, %v484_v38 }
  0xd0   :  { %v141_v19 = vmul.f32 %v309_v16, %v139_v9  ;;  %vm146_vm0 = vweird.f32 %v309_v16  ;;  %v192_v45 = vor.u32 1.1754944e-38, %v191_v37  ;;  %vm190_vm7 = vcmp.eq.f32.partialorder %v189_v41, 8.507059e+37 }
  0xd1   :  { %vm147_vm2 = vmor %vm145_vm1, %vm146_vm0 }
  0xd2   :  { %v142_v20 = vsub.f32 1.0, %v141_v19 }
  0xd4   :  { %v311_v23 = vpop.eup %310  ;;  %v143_v25 = vmul.f32 %v309_v16, %v142_v20 }
  0xd5   :  { %v181_v29 = vmul.f32 %v311_v23, %v179_v15  ;;  %vm186_vm4 = vweird.f32 %v311_v23 }
  0xd6   :  { %v144_v30 = vadd.f32 %v309_v16, %v143_v25  ;;  %vm187_vm6 = vmor %vm185_vm5, %vm186_vm4 }
  0xd7   :  { %v182_v33 = vsub.f32 1.0, %v181_v29 }
  0xd8   :  { %v148_v34 = vsel %vm147_vm2, %v309_v16, %v144_v30 }
  0xd9   :  { %v153_v39 = vsel %vm150_vm3, %v152_v32, %v148_v34  ;;  %v183_v40 = vmul.f32 %v311_v23, %v182_v33 }
  0xda   :  { %v154_v42 = vmul.f32 %v153_v39, %v129_v31 }
  0xdb   :  { %v184_v43 = vadd.f32 %v311_v23, %v183_v40 }
  0xdc   :  { %v266_v44 = vclamps-f32 %v154_v42, 1.0 }
  0xdd   :  { %v188_v28 = vsel %vm187_vm6, %v311_v23, %v184_v43 }
  0xde   :  { %v197_v48 = vadd.f32 1.0, %v266_v44  ;;  %v193_v49 = vsel %vm190_vm7, %v192_v45, %v188_v28 }
  0xdf   :  { %v194_v50 = vmul.f32 %v193_v49, %v169_v46 }
  0xe0   :  { %v199_v51 = vmul.f32 %v197_v48, %v113_v47 }
  0xe1   :  { %v267_v52 = vclamps-f32 %v194_v50, 1.0 }
  0xe2   :  { %237 = vmatmul.f32.vlgmr.msra.gmra.mxu1 %v199_v51 }
  0xe3   :  { %v198_v54 = vadd.f32 1.0, %v267_v52 }
  0xe5   :  { %v200_v55 = vmul.f32 %v198_v54, %v114_v53 }
  0xe7   :  { %240 = vmatmul.f32.vlgmr.msra.gmra.mxu3 %v200_v55 }
 0x15f   :  { %v238_v38 = vpop.f32.mrf.mxu1 }
 0x160   :  { %v239_v57 = vadd.f32 %v307_v56, %v238_v38 }
 0x162   :  { %244 = vst [vmem:[#allocation8] sm:$0xff] %v239_v57 }
 0x16a   :  { %v241_v26 = vpop.f32.mrf.mxu3 }
 0x16b   :  { %v242_v58 = vadd.f32 %v307_v56, %v241_v26 }
 0x16d   :  { %245 = vst [vmem:[#allocation8 + $0x8] sm:$0xff] %v242_v58 }
 0x16e   :  { %258 = dma.vmem_to_hbm [thread:$0]  %s251_s11, 256, %s253_s14, [#allocation4], %s415_s26, %s415_s26, %s416_s27  }
 0x16f   :  { %412 = dma.done.wait [#allocation4], 256  }
 0x170   :  { %413 = vsyncadd [#allocation4], 4294967040 }
 0x171   :  { %263 = vsyncpa [#allocation3], 1 }
 0x172   :  { %264 = vsyncpa [#allocation6], 1 }
 0x173   :  { %265 = vsyncpa [#allocation4], 1 }

</bundles_post_ra>
